<compile_context>
chip_gen: v6e
topology: v6e:2x2x1
jax: 0.10.0
libtpu: 0.0.40
codegen_flags: <defaults>
</compile_context>

<pallas_src>
import functools
import math

import jax
import jax.numpy as jnp
from jax.experimental import pallas as pl
from jax.experimental.pallas import tpu as pltpu

_NEG = -1e30  # finite "-inf" for the online LSE / padded-class masking


def _round_up(x, m):
    return (x + m - 1) // m * m


def _aam_kernel(x_ref, w_ref, label_ref, out_ref, loss_ref,
                m_sc, l_sc, t_sc,
                *, cos_m, sin_m, th, mm, s, n_class, mask_cols, mxu_dtype):
    j = pl.program_id(1)
    tile_b, tile_c = out_ref.shape

    # Init the online-softmax / target-logit accumulators at the first class tile.
    @pl.when(j == 0)
    def _init():
        m_sc[...] = jnp.full_like(m_sc, _NEG)
        l_sc[...] = jnp.zeros_like(l_sc)
        t_sc[...] = jnp.zeros_like(t_sc)

    x = x_ref[...]            # (tile_b, D) f32
    w = w_ref[...]            # (tile_c, D) f32
    lab = label_ref[...]      # (tile_b, 1) int32

    # F.normalize eps = 1e-12  ->  1/max(||v||, eps) == rsqrt(max(sum(v^2), eps^2))
    eps2 = jnp.float32(1e-24)
    rs_x = jax.lax.rsqrt(jnp.maximum(jnp.sum(x * x, axis=1, keepdims=True), eps2))      # (tile_b, 1)
    rs_w = jax.lax.rsqrt(jnp.maximum(jnp.sum(w * w, axis=1, keepdims=True), eps2)).T    # (1, tile_c)

    xd, wd = x, w
    if mxu_dtype is not None:
        xd = x.astype(mxu_dtype)
        wd = w.astype(mxu_dtype)

    # x @ w^T on the MXU without an explicit transpose: contract dim 1 of both.
    dot = jax.lax.dot_general(xd, wd, (((1,), (1,)), ((), ())),
                              preferred_element_type=jnp.float32)    # (tile_b, tile_c)
    # cosine = normalize(x) @ normalize(w)^T  via post-matmul rescale.
    cosine = dot * rs_x * rs_w

    # One-hot for this class tile (global column index == label).
    col0 = j * tile_c
    col_ids = jax.lax.broadcasted_iota(jnp.int32, (tile_b, tile_c), 1) + col0
    is_tgt = col_ids == lab                                          # (tile_b, tile_c)

    # Additive angular margin only on the target column: O(tile_b) work.
    cos_t = jnp.sum(jnp.where(is_tgt, cosine, 0.0), axis=1, keepdims=True)   # (tile_b, 1)
    sin_t = jnp.sqrt(jnp.clip(1.0 - cos_t * cos_t, 0.0, 1.0))
    phi_t = cos_t * cos_m - sin_t * sin_m
    phi_t = jnp.where(cos_t - th > 0, phi_t, cos_t - mm)

    output = jnp.where(is_tgt, phi_t, cosine) * s                    # (tile_b, tile_c)
    out_ref[...] = output

    # Accumulate the (scaled) target logit for rows whose label lives in this tile.
    in_tile = jnp.logical_and(lab >= col0, lab < col0 + tile_c)      # (tile_b, 1)
    t_sc[...] += jnp.where(in_tile, phi_t * s, 0.0)

    # Online log-sum-exp over the class axis (mask padded class columns if any).
    lse_in = output
    if mask_cols:
        lse_in = jnp.where(col_ids < n_class, output, _NEG)
    tile_max = jnp.max(lse_in, axis=1, keepdims=True)
    m_prev = m_sc[...]
    m_new = jnp.maximum(m_prev, tile_max)
    l_sc[...] = jnp.exp(m_prev - m_new) * l_sc[...] + \
        jnp.sum(jnp.exp(lse_in - m_new), axis=1, keepdims=True)
    m_sc[...] = m_new

    # Finalize per-row cross-entropy on the last class tile:  lse - target_logit.
    @pl.when(j == pl.num_programs(1) - 1)
    def _finalize():
        loss_ref[...] = m_sc[...] + jnp.log(l_sc[...]) - t_sc[...]


def aam_softmax_forward(x, weight, label, *, m, s,
                        tile_b=128, tile_c=512, mxu_dtype=None):
    """Returns (loss, output) matching AAMsoftmax.forward (easy_margin=False)."""
    x = x.astype(jnp.float32)
    weight = weight.astype(jnp.float32)
    B, D = x.shape
    C, D2 = weight.shape
    assert D == D2

    # Tile sizes: lane-dense class tiles (multiple of 128), sublane-aligned batch tiles.
    tile_b = min(tile_b, _round_up(B, 8))
    tile_c = min(tile_c, _round_up(C, 128))
    B_pad = _round_up(B, tile_b)
    C_pad = _round_up(C, tile_c)

    if B_pad != B:
        x = jnp.pad(x, ((0, B_pad - B), (0, 0)))
    if C_pad != C:
        weight = jnp.pad(weight, ((0, C_pad - C), (0, 0)))
    label2d = jnp.pad(label.astype(jnp.int32), (0, B_pad - B)).reshape(B_pad, 1)

    cos_m = math.cos(m)
    sin_m = math.sin(m)
    th = math.cos(math.pi - m)
    mm = math.sin(math.pi - m) * m

    kernel = functools.partial(
        _aam_kernel, cos_m=cos_m, sin_m=sin_m, th=th, mm=mm, s=float(s),
        n_class=C, mask_cols=(C_pad != C), mxu_dtype=mxu_dtype)

    nb, nc = B_pad // tile_b, C_pad // tile_c

    # VMEM budget from the tiles (double-buffered inputs/outputs) + headroom,
    # capped at 64 MiB so it is safe on v7x as well as v5e/v6e.
    est = 4 * (2 * (tile_b * D + tile_c * D + tile_b * tile_c + 2 * tile_b) + 3 * tile_b)
    vmem_limit = int(min(max(2 * est + (4 << 20), 32 << 20), 64 << 20))

    out_full, loss_rows = pl.pallas_call(
        kernel,
        out_shape=(
            jax.ShapeDtypeStruct((B_pad, C_pad), jnp.float32),   # scaled logits
            jax.ShapeDtypeStruct((B_pad, 1), jnp.float32),       # per-row CE loss
        ),
        grid_spec=pltpu.PrefetchScalarGridSpec(
            num_scalar_prefetch=0,
            grid=(nb, nc),
            in_specs=[
                pl.BlockSpec((tile_b, D), lambda i, j: (i, 0)),   # x tile (resident over j)
                pl.BlockSpec((tile_c, D), lambda i, j: (j, 0)),   # weight tile (streamed)
                pl.BlockSpec((tile_b, 1), lambda i, j: (i, 0)),   # labels
            ],
            out_specs=(
                pl.BlockSpec((tile_b, tile_c), lambda i, j: (i, j)),
                pl.BlockSpec((tile_b, 1), lambda i, j: (i, 0)),
            ),
            scratch_shapes=[
                pltpu.VMEM((tile_b, 1), jnp.float32),   # running max (m)
                pltpu.VMEM((tile_b, 1), jnp.float32),   # running sum (l)
                pltpu.VMEM((tile_b, 1), jnp.float32),   # target logit
            ],
        ),
        compiler_params=pltpu.CompilerParams(
            dimension_semantics=("parallel", "arbitrary"),
            vmem_limit_bytes=vmem_limit,
        ),
    )(x, weight, label2d)

    # Mean CE over the real batch rows (tiny O(B) reduction; batch axis is parallel-tiled).
    loss = jnp.sum(loss_rows[:B, 0]) / jnp.float32(B)
    output = out_full[:B, :C]
    return loss, output


if __name__ == "__main__":
    # Small shapes consistent with AAMsoftmax(n_class, m, s, em_dim); chosen so that
    # batch/class padding AND multi-tile online-LSE paths are exercised.
    n_class, em_dim = 200, 192
    margin_m, scale_s = 0.2, 30.0
    batch = 24

    key = jax.random.PRNGKey(0)
    kx, kw, kl = jax.random.split(key, 3)

    # xavier_normal_(weight, gain=1): std = sqrt(2 / (fan_in + fan_out))
    w_std = math.sqrt(2.0 / (n_class + em_dim))
    weight = jax.random.normal(kw, (n_class, em_dim), dtype=jnp.float32) * w_std
    x = jax.random.normal(kx, (batch, em_dim), dtype=jnp.float32)
    label = jax.random.randint(kl, (batch,), 0, n_class, dtype=jnp.int32)

    # Small tiles to force grid=(2, 2); production would use tile_b=128, tile_c=512,
    # and mxu_dtype=jnp.bfloat16 on v6e/v7x.
    loss, output = aam_softmax_forward(x, weight, label, m=margin_m, s=scale_s,
                                       tile_b=16, tile_c=128)
    jax.block_until_ready((loss, output))

    # Pure-JAX reference check (same math, no Pallas).
    def ref(x, w, label):
        xn = x / jnp.maximum(jnp.linalg.norm(x, axis=1, keepdims=True), 1e-12)
        wn = w / jnp.maximum(jnp.linalg.norm(w, axis=1, keepdims=True), 1e-12)
        cosine = jnp.dot(xn, wn.T, precision=jax.lax.Precision.HIGHEST)
        sine = jnp.sqrt(jnp.clip(1.0 - cosine * cosine, 0.0, 1.0))
        phi = cosine * math.cos(margin_m) - sine * math.sin(margin_m)
        th = math.cos(math.pi - margin_m)
        mm = math.sin(math.pi - margin_m) * margin_m
        phi = jnp.where(cosine - th > 0, phi, cosine - mm)
        one_hot = jax.nn.one_hot(label, n_class, dtype=jnp.float32)
        out = (one_hot * phi + (1.0 - one_hot) * cosine) * scale_s
        logp = jax.nn.log_softmax(out, axis=-1)
        l = -jnp.mean(jnp.take_along_axis(logp, label[:, None], axis=1))
        return l, out

    ref_loss, ref_out = ref(x, weight, label)
    assert jnp.allclose(output, ref_out, atol=2e-4, rtol=2e-4), \
        float(jnp.max(jnp.abs(output - ref_out)))
    assert jnp.allclose(loss, ref_loss, atol=2e-4, rtol=2e-4), \
        (float(loss), float(ref_loss))

    print("KERNEL_OK")
</pallas_src>

<mosaic_0001>
module attributes {stable_mosaic.version = 11 : i64} {
  func.func @_aam_kernel(%arg0: i32, %arg1: i32, %arg2: memref<16x192xf32, #tpu.memory_space<vmem>>, %arg3: memref<128x192xf32, #tpu.memory_space<vmem>>, %arg4: memref<16x1xi32, #tpu.memory_space<vmem>>, %arg5: memref<16x128xf32, #tpu.memory_space<vmem>>, %arg6: memref<16x1xf32, #tpu.memory_space<vmem>>, %arg7: memref<16x1xf32, #tpu.memory_space<vmem>>, %arg8: memref<16x1xf32, #tpu.memory_space<vmem>>, %arg9: memref<16x1xf32, #tpu.memory_space<vmem>>) attributes {dimension_semantics = [#tpu.dimension_semantics<parallel>, #tpu.dimension_semantics<arbitrary>], iteration_bounds = array<i64: 2, 2>, scalar_prefetch = 0 : i64, scratch_operands = 3 : i64, tpu.core_type = #tpu.core_type<tc>, window_params = [{transform_indices = @transform_0, window_bounds = array<i64: 16, 192>}, {transform_indices = @transform_1, window_bounds = array<i64: 128, 192>}, {transform_indices = @transform_2, window_bounds = array<i64: 16, 1>}, {transform_indices = @transform_3, window_bounds = array<i64: 16, 128>}, {transform_indices = @transform_4, window_bounds = array<i64: 16, 1>}]} {
    %c0_i32 = arith.constant 0 : i32
    %0 = arith.cmpi eq, %arg1, %c0_i32 : i32
    %1 = arith.extui %0 : i1 to i32
    %c0_i32_0 = arith.constant 0 : i32
    %2 = arith.cmpi ne, %1, %c0_i32_0 : i32
    scf.if %2 {
      %cst_42 = arith.constant -1.000000e+30 : f32
      %96 = vector.broadcast %cst_42 : f32 to vector<16x1xf32>
      %c0_43 = arith.constant 0 : index
      %c0_44 = arith.constant 0 : index
      %97 = vector.load %arg7[%c0_43, %c0_44] : memref<16x1xf32, #tpu.memory_space<vmem>>, vector<16x1xf32>
      tpu.vector_store %arg7[%c0_43, %c0_44], %96 {strides = array<i32>} : memref<16x1xf32, #tpu.memory_space<vmem>>, vector<16x1xf32>,
      %cst_45 = arith.constant 0.000000e+00 : f32
      %98 = vector.broadcast %cst_45 : f32 to vector<16x1xf32>
      %c0_46 = arith.constant 0 : index
      %c0_47 = arith.constant 0 : index
      %99 = vector.load %arg8[%c0_46, %c0_47] : memref<16x1xf32, #tpu.memory_space<vmem>>, vector<16x1xf32>
      tpu.vector_store %arg8[%c0_46, %c0_47], %98 {strides = array<i32>} : memref<16x1xf32, #tpu.memory_space<vmem>>, vector<16x1xf32>,
      %cst_48 = arith.constant 0.000000e+00 : f32
      %100 = vector.broadcast %cst_48 : f32 to vector<16x1xf32>
      %c0_49 = arith.constant 0 : index
      %c0_50 = arith.constant 0 : index
      %101 = vector.load %arg9[%c0_49, %c0_50] : memref<16x1xf32, #tpu.memory_space<vmem>>, vector<16x1xf32>
      tpu.vector_store %arg9[%c0_49, %c0_50], %100 {strides = array<i32>} : memref<16x1xf32, #tpu.memory_space<vmem>>, vector<16x1xf32>,
    } else {
    }
    %c0 = arith.constant 0 : index
    %c0_1 = arith.constant 0 : index
    %3 = vector.load %arg2[%c0, %c0_1] : memref<16x192xf32, #tpu.memory_space<vmem>>, vector<16x192xf32>
    %c0_2 = arith.constant 0 : index
    %c0_3 = arith.constant 0 : index
    %4 = vector.load %arg3[%c0_2, %c0_3] : memref<128x192xf32, #tpu.memory_space<vmem>>, vector<128x192xf32>
    %c0_4 = arith.constant 0 : index
    %c0_5 = arith.constant 0 : index
    %5 = vector.load %arg4[%c0_4, %c0_5] : memref<16x1xi32, #tpu.memory_space<vmem>>, vector<16x1xi32>
    %6 = arith.mulf %3, %3 : vector<16x192xf32>
    %cst = arith.constant dense<0.000000e+00> : vector<16xf32>
    %7 = vector.multi_reduction <add>, %6, %cst [1] : vector<16x192xf32> to vector<16xf32>
    %8 = vector.shape_cast %7 : vector<16xf32> to vector<16x1xf32>
    %cst_6 = arith.constant 1.000000e-24 : f32
    %9 = vector.broadcast %cst_6 : f32 to vector<16x1xf32>
    %10 = arith.maximumf %8, %9 : vector<16x1xf32>
    %11 = math.rsqrt %10 : vector<16x1xf32>
    %12 = arith.mulf %4, %4 : vector<128x192xf32>
    %cst_7 = arith.constant dense<0.000000e+00> : vector<128xf32>
    %13 = vector.multi_reduction <add>, %12, %cst_7 [1] : vector<128x192xf32> to vector<128xf32>
    %14 = vector.shape_cast %13 : vector<128xf32> to vector<128x1xf32>
    %cst_8 = arith.constant 1.000000e-24 : f32
    %15 = vector.broadcast %cst_8 : f32 to vector<128x1xf32>
    %16 = arith.maximumf %14, %15 : vector<128x1xf32>
    %17 = math.rsqrt %16 : vector<128x1xf32>
    %18 = tpu.transpose %17, [1, 0] : vector<128x1xf32> -> vector<1x128xf32>
    %cst_9 = arith.constant dense<0.000000e+00> : vector<16x128xf32>
    %19 = tpu.matmul %3, %4, %cst_9 {dimension_numbers = #tpu.dot_dimension_numbers<[1], [1], [0], [0], [0, 0, 1, 0], [], []>} : vector<16x192xf32>, vector<128x192xf32>, vector<16x128xf32> -> vector<16x128xf32>
    %20 = vector.broadcast %11 : vector<16x1xf32> to vector<16x128xf32>
    %21 = arith.mulf %19, %20 : vector<16x128xf32>
    %22 = vector.broadcast %18 : vector<1x128xf32> to vector<16x128xf32>
    %23 = arith.mulf %21, %22 : vector<16x128xf32>
    %c128_i32 = arith.constant 128 : i32
    %24 = arith.muli %arg1, %c128_i32 : i32
    %25 = tpu.iota {dimensions = array<i32: 1>} : vector<16x128xi32>
    %26 = vector.broadcast %24 : i32 to vector<16x128xi32>
    %27 = arith.addi %25, %26 : vector<16x128xi32>
    %28 = vector.broadcast %5 : vector<16x1xi32> to vector<16x128xi32>
    %29 = arith.cmpi eq, %27, %28 : vector<16x128xi32>
    %cst_10 = arith.constant 0.000000e+00 : f32
    %30 = vector.broadcast %cst_10 : f32 to vector<16x128xf32>
    %31 = arith.select %29, %23, %30 : vector<16x128xi1>, vector<16x128xf32>
    %cst_11 = arith.constant dense<0.000000e+00> : vector<16xf32>
    %32 = vector.multi_reduction <add>, %31, %cst_11 [1] : vector<16x128xf32> to vector<16xf32>
    %33 = vector.shape_cast %32 : vector<16xf32> to vector<16x1xf32>
    %34 = arith.mulf %33, %33 : vector<16x1xf32>
    %cst_12 = arith.constant 1.000000e+00 : f32
    %35 = vector.broadcast %cst_12 : f32 to vector<16x1xf32>
    %36 = arith.subf %35, %34 : vector<16x1xf32>
    %cst_13 = arith.constant 0.000000e+00 : f32
    %cst_14 = arith.constant 1.000000e+00 : f32
    %37 = vector.broadcast %cst_13 : f32 to vector<16x1xf32>
    %38 = arith.maximumf %37, %36 : vector<16x1xf32>
    %39 = vector.broadcast %cst_14 : f32 to vector<16x1xf32>
    %40 = arith.minimumf %39, %38 : vector<16x1xf32>
    %41 = math.sqrt %40 : vector<16x1xf32>
    %cst_15 = arith.constant 0.980066597 : f32
    %42 = vector.broadcast %cst_15 : f32 to vector<16x1xf32>
    %43 = arith.mulf %33, %42 : vector<16x1xf32>
    %cst_16 = arith.constant 0.198669329 : f32
    %44 = vector.broadcast %cst_16 : f32 to vector<16x1xf32>
    %45 = arith.mulf %41, %44 : vector<16x1xf32>
    %46 = arith.subf %43, %45 : vector<16x1xf32>
    %cst_17 = arith.constant -0.980066597 : f32
    %47 = vector.broadcast %cst_17 : f32 to vector<16x1xf32>
    %48 = arith.subf %33, %47 : vector<16x1xf32>
    %cst_18 = arith.constant 0.000000e+00 : f32
    %49 = vector.broadcast %cst_18 : f32 to vector<16x1xf32>
    %50 = arith.cmpf ogt, %48, %49 : vector<16x1xf32>
    %cst_19 = arith.constant 0.0397338644 : f32
    %51 = vector.broadcast %cst_19 : f32 to vector<16x1xf32>
    %52 = arith.subf %33, %51 : vector<16x1xf32>
    %53 = arith.select %50, %46, %52 : vector<16x1xi1>, vector<16x1xf32>
    %54 = vector.shape_cast %53 : vector<16x1xf32> to vector<16x1xf32>
    %55 = vector.broadcast %54 : vector<16x1xf32> to vector<16x128xf32>
    %56 = arith.select %29, %55, %23 : vector<16x128xi1>, vector<16x128xf32>
    %cst_20 = arith.constant 3.000000e+01 : f32
    %57 = vector.broadcast %cst_20 : f32 to vector<16x128xf32>
    %58 = arith.mulf %56, %57 : vector<16x128xf32>
    %c0_21 = arith.constant 0 : index
    %c0_22 = arith.constant 0 : index
    %59 = vector.load %arg5[%c0_21, %c0_22] : memref<16x128xf32, #tpu.memory_space<vmem>>, vector<16x128xf32>
    tpu.vector_store %arg5[%c0_21, %c0_22], %58 {strides = array<i32>} : memref<16x128xf32, #tpu.memory_space<vmem>>, vector<16x128xf32>,
    %60 = vector.broadcast %24 : i32 to vector<16x1xi32>
    %61 = arith.cmpi sge, %5, %60 : vector<16x1xi32>
    %c128_i32_23 = arith.constant 128 : i32
    %62 = arith.addi %24, %c128_i32_23 : i32
    %63 = vector.broadcast %62 : i32 to vector<16x1xi32>
    %64 = arith.cmpi slt, %5, %63 : vector<16x1xi32>
    %65 = arith.andi %61, %64 : vector<16x1xi1>
    %c0_24 = arith.constant 0 : index
    %c0_25 = arith.constant 0 : index
    %66 = vector.load %arg9[%c0_24, %c0_25] : memref<16x1xf32, #tpu.memory_space<vmem>>, vector<16x1xf32>
    %cst_26 = arith.constant 3.000000e+01 : f32
    %67 = vector.broadcast %cst_26 : f32 to vector<16x1xf32>
    %68 = arith.mulf %53, %67 : vector<16x1xf32>
    %cst_27 = arith.constant 0.000000e+00 : f32
    %69 = vector.broadcast %cst_27 : f32 to vector<16x1xf32>
    %70 = arith.select %65, %68, %69 : vector<16x1xi1>, vector<16x1xf32>
    %71 = arith.addf %66, %70 : vector<16x1xf32>
    %c0_28 = arith.constant 0 : index
    %c0_29 = arith.constant 0 : index
    %72 = vector.load %arg9[%c0_28, %c0_29] : memref<16x1xf32, #tpu.memory_space<vmem>>, vector<16x1xf32>
    tpu.vector_store %arg9[%c0_28, %c0_29], %71 {strides = array<i32>} : memref<16x1xf32, #tpu.memory_space<vmem>>, vector<16x1xf32>,
    %c200_i32 = arith.constant 200 : i32
    %73 = vector.broadcast %c200_i32 : i32 to vector<16x128xi32>
    %74 = arith.cmpi slt, %27, %73 : vector<16x128xi32>
    %cst_30 = arith.constant -1.000000e+30 : f32
    %75 = vector.broadcast %cst_30 : f32 to vector<16x128xf32>
    %76 = arith.select %74, %58, %75 : vector<16x128xi1>, vector<16x128xf32>
    %cst_31 = arith.constant dense<0xFF800000> : vector<16xf32>
    %77 = vector.multi_reduction <maximumf>, %76, %cst_31 [1] : vector<16x128xf32> to vector<16xf32>
    %78 = vector.shape_cast %77 : vector<16xf32> to vector<16x1xf32>
    %c0_32 = arith.constant 0 : index
    %c0_33 = arith.constant 0 : index
    %79 = vector.load %arg7[%c0_32, %c0_33] : memref<16x1xf32, #tpu.memory_space<vmem>>, vector<16x1xf32>
    %80 = arith.maximumf %79, %78 : vector<16x1xf32>
    %81 = arith.subf %79, %80 : vector<16x1xf32>
    %82 = math.exp %81 : vector<16x1xf32>
    %c0_34 = arith.constant 0 : index
    %c0_35 = arith.constant 0 : index
    %83 = vector.load %arg8[%c0_34, %c0_35] : memref<16x1xf32, #tpu.memory_space<vmem>>, vector<16x1xf32>
    %84 = arith.mulf %82, %83 : vector<16x1xf32>
    %85 = vector.broadcast %80 : vector<16x1xf32> to vector<16x128xf32>
    %86 = arith.subf %76, %85 : vector<16x128xf32>
    %87 = math.exp %86 : vector<16x128xf32>
    %cst_36 = arith.constant dense<0.000000e+00> : vector<16xf32>
    %88 = vector.multi_reduction <add>, %87, %cst_36 [1] : vector<16x128xf32> to vector<16xf32>
    %89 = vector.shape_cast %88 : vector<16xf32> to vector<16x1xf32>
    %90 = arith.addf %84, %89 : vector<16x1xf32>
    %c0_37 = arith.constant 0 : index
    %c0_38 = arith.constant 0 : index
    %91 = vector.load %arg8[%c0_37, %c0_38] : memref<16x1xf32, #tpu.memory_space<vmem>>, vector<16x1xf32>
    tpu.vector_store %arg8[%c0_37, %c0_38], %90 {strides = array<i32>} : memref<16x1xf32, #tpu.memory_space<vmem>>, vector<16x1xf32>,
    %c0_39 = arith.constant 0 : index
    %c0_40 = arith.constant 0 : index
    %92 = vector.load %arg7[%c0_39, %c0_40] : memref<16x1xf32, #tpu.memory_space<vmem>>, vector<16x1xf32>
    tpu.vector_store %arg7[%c0_39, %c0_40], %80 {strides = array<i32>} : memref<16x1xf32, #tpu.memory_space<vmem>>, vector<16x1xf32>,
    %c1_i32 = arith.constant 1 : i32
    %93 = arith.cmpi eq, %arg1, %c1_i32 : i32
    %94 = arith.extui %93 : i1 to i32
    %c0_i32_41 = arith.constant 0 : i32
    %95 = arith.cmpi ne, %94, %c0_i32_41 : i32
    scf.if %95 {
      %c0_42 = arith.constant 0 : index
      %c0_43 = arith.constant 0 : index
      %96 = vector.load %arg7[%c0_42, %c0_43] : memref<16x1xf32, #tpu.memory_space<vmem>>, vector<16x1xf32>
      %c0_44 = arith.constant 0 : index
      %c0_45 = arith.constant 0 : index
      %97 = vector.load %arg8[%c0_44, %c0_45] : memref<16x1xf32, #tpu.memory_space<vmem>>, vector<16x1xf32>
      %98 = math.log %97 : vector<16x1xf32>
      %99 = arith.addf %96, %98 : vector<16x1xf32>
      %c0_46 = arith.constant 0 : index
      %c0_47 = arith.constant 0 : index
      %100 = vector.load %arg9[%c0_46, %c0_47] : memref<16x1xf32, #tpu.memory_space<vmem>>, vector<16x1xf32>
      %101 = arith.subf %99, %100 : vector<16x1xf32>
      %c0_48 = arith.constant 0 : index
      %c0_49 = arith.constant 0 : index
      %102 = vector.load %arg6[%c0_48, %c0_49] : memref<16x1xf32, #tpu.memory_space<vmem>>, vector<16x1xf32>
      tpu.vector_store %arg6[%c0_48, %c0_49], %101 {strides = array<i32>} : memref<16x1xf32, #tpu.memory_space<vmem>>, vector<16x1xf32>,
    } else {
    }
    return
  }
  func.func @transform_0(%arg0: i32, %arg1: i32) -> (i32, i32) {
    %c0_i32 = arith.constant 0 : i32
    %c0_i32_0 = arith.constant 0 : i32
    return %arg0, %c0_i32 : i32, i32
  }
  func.func @transform_1(%arg0: i32, %arg1: i32) -> (i32, i32) {
    %c0_i32 = arith.constant 0 : i32
    %c0_i32_0 = arith.constant 0 : i32
    return %arg1, %c0_i32 : i32, i32
  }
  func.func @transform_2(%arg0: i32, %arg1: i32) -> (i32, i32) {
    %c0_i32 = arith.constant 0 : i32
    %c0_i32_0 = arith.constant 0 : i32
    return %arg0, %c0_i32 : i32, i32
  }
  func.func @transform_3(%arg0: i32, %arg1: i32) -> (i32, i32) {
    %c0_i32 = arith.constant 0 : i32
    return %arg0, %arg1 : i32, i32
  }
  func.func @transform_4(%arg0: i32, %arg1: i32) -> (i32, i32) {
    %c0_i32 = arith.constant 0 : i32
    %c0_i32_0 = arith.constant 0 : i32
    return %arg0, %c0_i32 : i32, i32
  }
}

</mosaic_0001>

<bundles_post_ra>
// kernel: tpu_custom_call.1
= control target key start
LH: loop header
LB: loop body
LE: loop exit
PB: predicated region body
PF: predicated region fallthrough
CT: control target
= control target key end

     0   :  { %10 = vsyncpa [#allocation6], 0  ;;  %s1758_s0 = inlined_call_operand.vmem [shape: f32[32,192], index: 0, kind: input, shape index: {}]   ;;  %s1759_s1 = inlined_call_operand.vmem [shape: f32[256,192], index: 1, kind: input, shape index: {}]   ;;  %s1760_s2 = inlined_call_operand.vmem [shape: s32[32,1], index: 2, kind: input, shape index: {}]   ;;  %s1761_s3 = inlined_call_operand.hbm [shape: f32[32,256], index: 3, kind: output, shape index: {0}]   ;;  %s1762_s4 = inlined_call_operand.vmem [shape: f32[32,1], index: 4, kind: output, shape index: {1}]  }
   0x1   :  { %12 = vsyncpa [#allocation6 + $0x1], 0  ;;  %s1275_s15 = smov 0   ;;  %s1277_s16 = smov 0  }
   0x2   :  { %s1279_s17 = smov 0   ;;  %s1281_s18 = smov 0  }
   0x3   :  { %s1283_s19 = smov 0   ;;  %s1285_s20 = smov 0  }
   0x4   :  { %s1287_s21 = smov 0   ;;  %s1289_s22 = smov 0  }
   0x5 LB: > { %1768 = sst [smem:[#allocation8_spill]] %s1233_s20  ;;  %s936_s23 = sadd.s32 4294967295, %s1241_s22   ;;  %s1241_s22 = sphi %s1289_s22, %s18_s22   ;;  %s1237_s21 = sphi %s1287_s21, %s1782_s21   ;;  %s1233_s20 = sphi %s1285_s20, %s1781_s20   ;;  %s1229_s19 = sphi %s1283_s19, %s1780_s19   ;;  %s1225_s18 = sphi %s1281_s18, %s1779_s18   ;;  %s1221_s17 = sphi %s1279_s17, %s1785_s17   ;;  %s1217_s16 = sphi %s1277_s16, %s1784_s16   ;;  %s1213_s15 = sphi %s1275_s15, %s1783_s15  }
   0x6   : > { %1769 = sst [smem:[#allocation9_spill]] %s1237_s21  ;;  %s937_s24 = sadd.s32 4294967294, %s1241_s22  }
   0x7   : > { %s27_s25 = sadd.s32 1, %s1233_s20  ;;  %s30_s26 = sadd.s32 1, %s1237_s21 }
   0x8   : > { %p28_p0 = scmp.ge.s32.totalorder %s27_s25, 2  ;;  %p127_p1 = scmp.ne.s32.totalorder %s1221_s17, %s1217_s16 }
   0x9   : > { %p128_p2 = scmp.eq.s32.totalorder %s936_s23, 3  ;;  %p133_p5 = scmp.ne.s32.totalorder %s1217_s16, %s1213_s15 }
   0xa   : > { %s1787_s25 = smov (%p28_p0, %s27_s25), 0  ;;  %s1789_s26 = smov (!%p28_p0, %s30_s26), %s1237_s21 }
   0xb   : > { %1770 = sst [smem:[#allocation10_spill]] %s1787_s25  ;;  %s113_s27 = ssub.s32 %s1233_s20, %s1787_s25 }
   0xc   : > { %p1326_p3 = por %p128_p2, %p127_p1  ;;  %p32_p4 = scmp.ge.s32.totalorder %s1789_s26, 2 }
   0xd   : > { %p134_p6 = scmp.eq.s32.totalorder %s937_s24, 3  ;;  %p940_p7 = scmp.ge.s32.totalorder %s1241_s22, 1 }
   0xe   : > { %s1791_s26 = smov (%p32_p4, %s1789_s26), 0  ;;  %p207_p9 = scmp.lt.s32.totalorder %s1241_s22, 5 }
   0xf   : > { %1772 = sst [smem:[#allocation11_spill]] %s1791_s26  ;;  %p1335_p8 = por %p134_p6, %p133_p5 }
  0x10   : > { %s112_s30 = ssub.s32 %s1237_s21, %s1791_s26  ;;  %s117_s5 = sadd.s32 1, %s1221_s17 }
  0x11   : > { %s114_s6 = sor.u32 %s113_s27, %s112_s30  ;;  %p208_p10 = pnand %p940_p7, %p207_p9 }
  0x12   : > { %p115_p11 = scmp.eq.s32.totalorder %s114_s6, 0  ;;  %s1764_s8 = sand.u32 (!%p208_p10), 1, %s1217_s16  }
  0x13   : > { %211 = sbr.rel (%p208_p10) target bundleno = 983 (0x3d7), region = 32  ;;  %s942_s9 = sshll.u32 (!%p208_p10), %s1229_s19, 1 }
  0x14   : > { %s1344_s7 = scalar_select %p115_p11, %s1221_s17, %s117_s5  }
  0x15   : > { %s941_s10 = sshll.u32 (!%p208_p10), %s1764_s8, 4  ;;  %p251_p12 = scmp.lt.s32.totalorder (!%p208_p10), %s942_s9, 3 }
  0x16   : > { %s945_s11 = sshll.u32 (!%p208_p10), %s1225_s18, 4  ;;  %s1371_s14 = scalar_lea.vmem (!%p208_p10), [#allocation5], %s941_s10 }
  0x17   : > { %p258_p13 = scmp.lt.s32.totalorder (!%p208_p10), %s945_s11, 31  ;;  %p952_p0 = scmp.ne.s32.totalorder (!%p208_p10), %s1225_s18, 0 }
  0x18   : > { %s1793_s9 = smov (!%p251_p12, %s942_s9), 3 }
  0x19   : > { %s983_s12 = sshll.u32 %s1793_s9, 4  ;;  %s949_s13 = sshll.u32 %s1793_s9, 3 }
  0x1a   : > { %s1354_s24 = scalar_lea.vmem %s1758_s0, %s983_s12  ;;  %s1359_s5 = scalar_lea.vmem %s1760_s2, %s949_s13 }
  0x1b   : > { %s1795_s11 = smov (!%p258_p13, %s945_s11), 31  ;;  %s1364_s8 = scalar_lea.vmem %s1762_s4, %s949_s13 }
  0x1c   : > { %s984_s25 = sshll.u32 %s1795_s11, 4  ;;  %280 = sbr.rel (%p952_p0) target bundleno = 37 (0x25), region = 36 }
  0x1d   : > { %s1369_s9 = scalar_lea.vmem %s1759_s1, %s984_s25 }
  0x21   : > { %vm281_vm0 = vcmask 7168   ;;  %v1243_v0 = vmov -1e+30   ;;  %v1244_v1 = vmov 0.0  }
  0x22   : > { %282 = vst.msk [vmem:[#allocation2] sm:$0xff] %vm281_vm0, %v1243_v0  ;;  %283 = vst.msk [vmem:[#allocation2 + $0x8] sm:$0xff] %vm281_vm0, %v1243_v0 }
  0x23   : > { %284 = vst.msk [vmem:[#allocation3] sm:$0xff] %vm281_vm0, %v1244_v1  ;;  %285 = vst.msk [vmem:[#allocation3 + $0x8] sm:$0xff] %vm281_vm0, %v1244_v1 }
  0x24   : > { %286 = vst.msk [vmem:[#allocation4] sm:$0xff] %vm281_vm0, %v1244_v1  ;;  %287 = vst.msk [vmem:[#allocation4 + $0x8] sm:$0xff] %vm281_vm0, %v1244_v1 }
  0x25 PF: > { %v1375_v2 = vld [vmem:[%s1369_s9 + $0xf8] sm:$0xff]  ;;  %vm330_vm1 = vcmask 523264   ;;  %v1378_v3 = vld [vmem:[%s1369_s9 + $0xf0] sm:$0xff]  ;;  %v1381_v4 = vld [vmem:[%s1369_s9 + $0xe8] sm:$0xff]  ;;  %v1245_v18 = vmov 0   ;;  %s971_s20 = sshll.u32 %s1225_s18, 7 }
  0x26   : > { %986 = vmatprep.subr.msk.mxu1 %vm330_vm1, %v1375_v2  ;;  %v1386_v5 = vld [vmem:[%s1369_s9] sm:$0xff]  ;;  %v1389_v6 = vld [vmem:[%s1369_s9 + $0x8] sm:$0xff]  ;;  %953 = vmatprep.subr.msk.mxu0 %vm330_vm1, %v1375_v2  ;;  %v1399_v9 = vld [vmem:[%s1369_s9 + $0x10] sm:$0xff]  ;;  %s1535_s21 = sadd.s32 128, %s971_s20  ;;  %vm717_vm0 = vcmask 7168   ;;  %p976_p1 = scmp.ne.s32.totalorder %s1225_s18, 1 }
  0x27   : > { %1002 = vmatpush1.xpose.msra.mxu1 %v1378_v3  ;;  %v343_v7 = vmul.f32 %v1386_v5, %v1386_v5  ;;  %v344_v8 = vmul.f32 %v1389_v6, %v1389_v6  ;;  %558 = vmatpush1.xpose.msra.mxu0 %v1378_v3  ;;  %v1405_v10 = vld [vmem:[%s1369_s9 + $0xe0] sm:$0xff]  ;;  %v1408_v11 = vld [vmem:[%s1369_s9 + $0x18] sm:$0xff]  ;;  %v345_v12 = vmul.f32 %v1399_v9, %v1399_v9  ;;  %v1424_v17 = vld [vmem:[%s1369_s9 + $0x28] sm:$0xff] }
  0x28   : > { %987 = vmatprep.subr.msk.mxu1 %vm330_vm1, %v1381_v4  ;;  %954 = vmatprep.subr.msk.mxu0 %vm330_vm1, %v1381_v4  ;;  %v1416_v14 = vld [vmem:[%s1369_s9 + $0xd8] sm:$0xff]  ;;  %v346_v15 = vmul.f32 %v1408_v11, %v1408_v11  ;;  %v1421_v16 = vld [vmem:[%s1369_s9 + $0x20] sm:$0xff]  ;;  %v348_v21 = vmul.f32 %v1424_v17, %v1424_v17  ;;  %v1431_v22 = vld [vmem:[%s1369_s9 + $0x30] sm:$0xff] }
  0x29   : > { %v375_v13 = vsel %vm330_vm1, %v344_v8, 0.0  ;;  %1096 = vset.pattern.permute.xlu1 %v1245_v18  ;;  %1095 = vset.pattern.permute.xlu0 %v1245_v18  ;;  %v347_v20 = vmul.f32 %v1421_v16, %v1421_v16  ;;  %v1434_v23 = vld [vmem:[%s1369_s9 + $0x38] sm:$0xff]  ;;  %v349_v25 = vmul.f32 %v1431_v22, %v1431_v22  ;;  %v1443_v27 = vld [vmem:[%s1369_s9 + $0x40] sm:$0xff]  ;;  %v1449_v28 = vld [vmem:[%s1369_s9 + $0xd0] sm:$0xff] }
  0x2a   : > { %v376_v19 = vadd.f32 %v375_v13, %v343_v7  ;;  %v379_v24 = vsel %vm330_vm1, %v346_v15, 0.0  ;;  %v350_v26 = vmul.f32 %v1434_v23, %v1434_v23  ;;  %v383_v30 = vsel %vm330_vm1, %v348_v21, 0.0  ;;  %v1453_v31 = vld [vmem:[%s1369_s9 + $0x48] sm:$0xff]  ;;  %v1464_v37 = vld [vmem:[%s1369_s9 + $0x50] sm:$0xff]  ;;  %v1467_v38 = vld [vmem:[%s1369_s9 + $0x58] sm:$0xff] }
  0x2b   : > { %1003 = vmatpush1.xpose.msra.mxu1 %v1405_v10  ;;  %560 = vmatpush1.xpose.msra.mxu0 %v1405_v10  ;;  %v380_v29 = vadd.f32 %v379_v24, %v345_v12  ;;  %v351_v32 = vmul.f32 %v1443_v27, %v1443_v27  ;;  %v1458_v33 = vld [vmem:[%s1369_s9 + $0xc8] sm:$0xff]  ;;  %v384_v34 = vadd.f32 %v383_v30, %v347_v20  ;;  %v1474_v40 = vld [vmem:[%s1369_s9 + $0x60] sm:$0xff]  ;;  %v1489_v47 = vld [vmem:[%s1369_s9 + $0x78] sm:$0xff]  ;;  %v1544_v21 = vstv %s971_s20 }
  0x2c   : > { %377 = vadd.xlane.f32.xlu0 %v376_v19  ;;  %988 = vmatprep.subr.msk.mxu1 %vm330_vm1, %v1416_v14  ;;  %v387_v35 = vsel %vm330_vm1, %v350_v26, 0.0  ;;  %v352_v36 = vmul.f32 %v1453_v31, %v1453_v31  ;;  %v354_v39 = vmul.f32 %v1467_v38, %v1467_v38  ;;  %v1477_v41 = vld [vmem:[%s1369_s9 + $0x68] sm:$0xff]  ;;  %v1481_v42 = vld [vmem:[%s1369_s9 + $0xc0] sm:$0xff]  ;;  %v353_v45 = vmul.f32 %v1464_v37, %v1464_v37  ;;  %v1492_v48 = vld [vmem:[%s1354_s24 + $0x18] sm:$0xff] }
  0x2d   : > { %955 = vmatprep.subr.msk.mxu0 %vm330_vm1, %v1416_v14  ;;  %385 = vadd.xlane.f32.xlu1 %v384_v34  ;;  %v388_v43 = vadd.f32 %v387_v35, %v349_v25  ;;  %v356_v46 = vmul.f32 %v1477_v41, %v1477_v41  ;;  %v1498_v51 = vld [vmem:[%s1369_s9 + $0x88] sm:$0xff]  ;;  %v355_v52 = vmul.f32 %v1474_v40, %v1474_v40  ;;  %v1503_v53 = vld [vmem:[%s1369_s9 + $0x70] sm:$0xff]  ;;  %v315_v56 = vld [vmem:[%s1369_s9 + $0xb8] sm:$0xff] }
  0x2e   : > { %v391_v44 = vsel %vm330_vm1, %v352_v36, 0.0  ;;  %v395_v50 = vsel %vm330_vm1, %v354_v39, 0.0  ;;  %v358_v54 = vmul.f32 %v1489_v47, %v1489_v47  ;;  %v1508_v55 = vld [vmem:[%s1354_s24 + $0x8] sm:$0xff]  ;;  %v360_v58 = vmul.f32 %v1498_v51, %v1498_v51  ;;  %970 = vmatprep.mubr.msk.f32.mxu1 %vm330_vm1, %v1492_v48  ;;  %v311_v59 = vld [vmem:[%s1369_s9 + $0x98] sm:$0xff]  ;;  %v1524_v61 = vld [vmem:[%s1369_s9 + $0x80] sm:$0xff] }
  0x2f   : > { %1004 = vmatpush1.xpose.msra.mxu1 %v1449_v28  ;;  %v392_v49 = vadd.f32 %v391_v44, %v351_v32  ;;  %v399_v57 = vsel %vm330_vm1, %v356_v46, 0.0  ;;  %562 = vmatpush1.xpose.msra.mxu0 %v1449_v28  ;;  %v396_v60 = vadd.f32 %v395_v50, %v353_v45  ;;  %v357_v62 = vmul.f32 %v1503_v53, %v1503_v53  ;;  %v314_v63 = vld [vmem:[%s1369_s9 + $0xb0] sm:$0xff]  ;;  %v313_v0 = vld [vmem:[%s1369_s9 + $0xa8] sm:$0xff]  ;;  %v312_v24 = vld [vmem:[%s1369_s9 + $0xa0] sm:$0xff] }
  0x30   : > { %381 = vadd.xlane.f32.xlu0 %v380_v29  ;;  %989 = vmatprep.subr.msk.mxu1 %vm330_vm1, %v1458_v33  ;;  %v400_v1 = vadd.f32 %v399_v57, %v355_v52  ;;  %v403_v7 = vsel %vm330_vm1, %v358_v54, 0.0  ;;  %v359_v8 = vmul.f32 %v1524_v61, %v1524_v61  ;;  %v362_v12 = vmul.f32 %v311_v59, %v311_v59  ;;  %v310_v18 = vld [vmem:[%s1369_s9 + $0x90] sm:$0xff]  ;;  %v1542_v20 = vld [vmem:[%s1359_s5 + $0x8] sm:$0xff] }
  0x31   : > { %956 = vmatprep.subr.msk.mxu0 %vm330_vm1, %v1458_v33  ;;  %969 = vmatprep.mubr.msk.f32.mxu0 %vm330_vm1, %v1508_v55  ;;  %v407_v13 = vsel %vm330_vm1, %v360_v58, 0.0  ;;  %v364_v15 = vmul.f32 %v313_v0, %v313_v0  ;;  %v366_v19 = vmul.f32 %v315_v56, %v315_v56  ;;  %v404_v25 = vadd.f32 %v403_v7, %v357_v62 }
  0x32   : > { %389 = vadd.xlane.f32.xlu1 %v388_v43  ;;  %v361_v26 = vmul.f32 %v310_v18, %v310_v18  ;;  %vm702_vm2 = vcmp.ge.s32.totalorder %v1542_v20, %v1544_v21  ;;  %v704_v29 = vstv %s1535_s21  ;;  %v408_v30 = vadd.f32 %v407_v13, %v359_v8 }
  0x33   : > { %1005 = vmatpush1.xpose.msra.mxu1 %v1481_v42  ;;  %564 = vmatpush1.xpose.msra.mxu0 %v1481_v42  ;;  %v411_v32 = vsel %vm330_vm1, %v362_v12, 0.0  ;;  %v363_v34 = vmul.f32 %v312_v24, %v312_v24  ;;  %vm706_vm3 = vcmp.lt.s32.totalorder %v1542_v20, %v704_v29  ;;  %v415_v35 = vsel %vm330_vm1, %v364_v15, 0.0 }
  0x34   : > { %990 = vmatprep.subr.msk.mxu1 %vm330_vm1, %v315_v56  ;;  %393 = vadd.xlane.f32.xlu0 %v392_v49  ;;  %v368_v36 = vmul.f32 %v1458_v33, %v1458_v33  ;;  %vm1558_vm4 = vmand %vm702_vm2, %vm706_vm3  ;;  %v412_v43 = vadd.f32 %v411_v32, %v361_v26  ;;  %v365_v44 = vmul.f32 %v314_v63, %v314_v63  ;;  %v419_v46 = vsel %vm330_vm1, %v366_v19, 0.0 }
  0x35   : > { %957 = vmatprep.subr.msk.mxu0 %vm330_vm1, %v315_v56  ;;  %v416_v45 = vadd.f32 %v415_v35, %v363_v34  ;;  %v367_v49 = vmul.f32 %v1481_v42, %v1481_v42  ;;  %v370_v33 = vmul.f32 %v1416_v14, %v1416_v14  ;;  %v372_v52 = vmul.f32 %v1381_v4, %v1381_v4 }
  0x36   : > { %397 = vadd.xlane.f32.xlu1 %v396_v60  ;;  %v423_v50 = vsel %vm330_vm1, %v368_v36, 0.0  ;;  %v420_v54 = vadd.f32 %v419_v46, %v365_v44  ;;  %v369_v56 = vmul.f32 %v1449_v28, %v1449_v28  ;;  %v374_v42 = vmul.f32 %v1375_v2, %v1375_v2  ;;  %v288_v60 = vld [vmem:[%s1354_s24] sm:$0xff] }
  0x37   : > { %1006 = vmatpush1.xpose.msra.mxu1 %v314_v63  ;;  %566 = vmatpush1.xpose.msra.mxu0 %v314_v63  ;;  %v424_v14 = vadd.f32 %v423_v50, %v367_v49  ;;  %v427_v57 = vsel %vm330_vm1, %v370_v33, 0.0  ;;  %v371_v4 = vmul.f32 %v1405_v10, %v1405_v10  ;;  %v431_v58 = vsel %vm330_vm1, %v372_v52, 0.0 }
  0x38   : > { %991 = vmatprep.subr.msk.mxu1 %vm330_vm1, %v313_v0  ;;  %401 = vadd.xlane.f32.xlu0 %v400_v1  ;;  %v428_v2 = vadd.f32 %v427_v57, %v369_v56  ;;  %v373_v28 = vmul.f32 %v1378_v3, %v1378_v3  ;;  %v435_v62 = vsel %vm330_vm1, %v374_v42, 0.0  ;;  %v290_v3 = vld [vmem:[%s1354_s24 + $0x10] sm:$0xff] }
  0x39   : > { %958 = vmatprep.subr.msk.mxu0 %vm330_vm1, %v313_v0  ;;  %v432_v10 = vadd.f32 %v431_v58, %v371_v4  ;;  %v328_v0 = vmul.f32 %v290_v3, %v290_v3 }
  0x3a   : > { %405 = vadd.xlane.f32.xlu1 %v404_v25  ;;  %v436_v1 = vadd.f32 %v435_v62, %v373_v28 }
  0x3b   : > { %1007 = vmatpush1.xpose.msra.mxu1 %v312_v24  ;;  %568 = vmatpush1.xpose.msra.mxu0 %v312_v24 }
  0x3c   : > { %992 = vmatprep.subr.msk.mxu1 %vm330_vm1, %v311_v59  ;;  %409 = vadd.xlane.f32.xlu0 %v408_v30 }
  0x3d   : > { %959 = vmatprep.subr.msk.mxu0 %vm330_vm1, %v311_v59  ;;  %v327_v59 = vmul.f32 %v1508_v55, %v1508_v55  ;;  %v329_v55 = vmul.f32 %v1492_v48, %v1492_v48 }
  0x3e   : > { %413 = vadd.xlane.f32.xlu1 %v412_v43 }
  0x3f   : > { %1008 = vmatpush1.xpose.msra.mxu1 %v310_v18  ;;  %570 = vmatpush1.xpose.msra.mxu0 %v310_v18  ;;  %v331_v63 = vsel %vm330_vm1, %v327_v59, 0.0  ;;  %v335_v48 = vsel %vm330_vm1, %v329_v55, 0.0 }
  0x40   : > { %993 = vmatprep.subr.msk.mxu1 %vm330_vm1, %v1498_v51  ;;  %417 = vadd.xlane.f32.xlu0 %v416_v45 }
  0x41   : > { %960 = vmatprep.subr.msk.mxu0 %vm330_vm1, %v1498_v51  ;;  %v326_v51 = vmul.f32 %v288_v60, %v288_v60 }
  0x42   : > { %421 = vadd.xlane.f32.xlu1 %v420_v54 }
  0x43   : > { %1009 = vmatpush1.xpose.msra.mxu1 %v1524_v61  ;;  %572 = vmatpush1.xpose.msra.mxu0 %v1524_v61  ;;  %v332_v7 = vadd.f32 %v331_v63, %v326_v51  ;;  %v324_v61 = vld [vmem:[%s1359_s5] sm:$0xff] }
  0x44   : > { %994 = vmatprep.subr.msk.mxu1 %vm330_vm1, %v1489_v47  ;;  %425 = vadd.xlane.f32.xlu0 %v424_v14  ;;  %vm701_vm5 = vcmp.ge.s32.totalorder %v324_v61, %v1544_v21  ;;  %vm705_vm6 = vcmp.lt.s32.totalorder %v324_v61, %v704_v29 }
  0x45   : > { %961 = vmatprep.subr.msk.mxu0 %vm330_vm1, %v1489_v47  ;;  %v336_v47 = vadd.f32 %v335_v48, %v328_v0  ;;  %vm1613_vm7 = vmand %vm701_vm5, %vm705_vm6 }
  0x46   : > { %429 = vadd.xlane.f32.xlu1 %v428_v2 }
  0x47   : > { %1010 = vmatpush1.xpose.msra.mxu1 %v1503_v53  ;;  %574 = vmatpush1.xpose.msra.mxu0 %v1503_v53 }
  0x48   : > { %995 = vmatprep.subr.msk.mxu1 %vm330_vm1, %v1477_v41  ;;  %433 = vadd.xlane.f32.xlu0 %v432_v10 }
  0x49   : > { %962 = vmatprep.subr.msk.mxu0 %vm330_vm1, %v1477_v41 }
  0x4a   : > { %437 = vadd.xlane.f32.xlu1 %v436_v1  ;;  %v634_v1 = vlaneseq }
  0x4b   : > { %1011 = vmatpush1.xpose.msra.mxu1 %v1474_v40  ;;  %576 = vmatpush1.xpose.msra.mxu0 %v1474_v40 }
  0x4c   : > { %996 = vmatprep.subr.msk.mxu1 %vm330_vm1, %v1467_v38  ;;  %333 = vadd.xlane.f32.xlu0 %v332_v7  ;;  %v635_v48 = vshrl.u32 %v634_v1, 7 }
  0x4d   : > { %963 = vmatprep.subr.msk.mxu0 %vm330_vm1, %v1467_v38 }
  0x4e   : > { %337 = vadd.xlane.f32.xlu1 %v336_v47 }
  0x4f   : > { %1012 = vmatpush1.xpose.msra.mxu1 %v1464_v37  ;;  %578 = vmatpush1.xpose.msra.mxu0 %v1464_v37 }
  0x50   : > { %997 = vmatprep.subr.msk.mxu1 %vm330_vm1, %v1453_v31  ;;  %964 = vmatprep.subr.msk.mxu0 %vm330_vm1, %v1453_v31 }
  0x53   : > { %1013 = vmatpush1.xpose.msra.mxu1 %v1443_v27  ;;  %580 = vmatpush1.xpose.msra.mxu0 %v1443_v27 }
  0x54   : > { %998 = vmatprep.subr.msk.mxu1 %vm330_vm1, %v1434_v23  ;;  %965 = vmatprep.subr.msk.mxu0 %vm330_vm1, %v1434_v23 }
  0x57   : > { %1014 = vmatpush1.xpose.msra.mxu1 %v1431_v22  ;;  %582 = vmatpush1.xpose.msra.mxu0 %v1431_v22 }
  0x58   : > { %999 = vmatprep.subr.msk.mxu1 %vm330_vm1, %v1424_v17  ;;  %966 = vmatprep.subr.msk.mxu0 %vm330_vm1, %v1424_v17 }
  0x5b   : > { %1015 = vmatpush1.xpose.msra.mxu1 %v1421_v16  ;;  %584 = vmatpush1.xpose.msra.mxu0 %v1421_v16 }
  0x5c   : > { %1000 = vmatprep.subr.msk.mxu1 %vm330_vm1, %v1408_v11  ;;  %967 = vmatprep.subr.msk.mxu0 %vm330_vm1, %v1408_v11 }
  0x5f   : > { %1016 = vmatpush1.xpose.msra.mxu1 %v1399_v9  ;;  %649 = vperm.xlu1 %1096, %v1542_v20  }
  0x60   : > { %1001 = vmatprep.subr.msk.mxu1 %vm330_vm1, %v1389_v6  ;;  %586 = vmatpush1.xpose.msra.mxu0 %v1399_v9 }
  0x61   : > { %968 = vmatprep.subr.msk.mxu0 %vm330_vm1, %v1389_v6 }
  0x62   : > { %646 = vperm.xlu0 %1095, %v324_v61   ;;  %v642_v61 = vand.u32 127, %v634_v1  ;;  %v727_v1 = vld [vmem:[#allocation2] sm:$0xff] }
  0x63   : > { %1017 = vmatpush1.xpose.msra.mxu1 %v1386_v5 }
  0x64   : > { %588 = vmatpush1.xpose.msra.mxu0 %v1386_v5 }
  0x66   : > { %627 = vmatmul.mubr.f32.vlgmr.msra.gmra.mxu1 %v290_v3 }
  0x67   : > { %622 = vmatmul.mubr.f32.vlgmr.msra.gmra.mxu0 %v288_v60 }
  0xb5   : > { %v378_v11 = vpop.xlane.xlu0 %377 }
  0xb6   : > { %v439_v16 = vmax.f32 %v378_v11, 1e-24  ;;  %v386_v17 = vpop.xlane.xlu1 %385  ;;  %v636_v11 = vsub.s32 0, %v635_v48 }
  0xb7   : > { %v441_v27 = vmax.f32 %v386_v17, 1e-24 }
  0xb8   : > { %1097 = vrsqrt.f32 %v439_v16 }
  0xb9   : > { %v382_v22 = vpop.xlane.xlu0 %381 }
  0xba   : > { %v440_v23 = vmax.f32 %v382_v22, 1e-24  ;;  %v1658_v22 = vadd.s32 %v1544_v21, %v642_v61 }
  0xbb   : > { %v390_v31 = vpop.xlane.xlu1 %389 }
  0xbc   : > { %1099 = vrsqrt.f32 %v440_v23  ;;  %v442_v9 = vmax.f32 %v390_v31, 1e-24  ;;  %vm720_vm15 = vcmp.lt.s32.totalorder %v1658_v22, 200 }
  0xbd   : > { %1101 = vrsqrt.f32 %v441_v27  ;;  %v394_v37 = vpop.xlane.xlu0 %393 }
  0xbe   : > { %1103 = vrsqrt.f32 %v442_v9  ;;  %v443_v6 = vmax.f32 %v394_v37, 1e-24 }
  0xbf   : > { %v398_v38 = vpop.xlane.xlu1 %397 }
  0xc0   : > { %1105 = vrsqrt.f32 %v443_v6  ;;  %v444_v5 = vmax.f32 %v398_v38, 1e-24 }
  0xc1   : > { %v402_v41 = vpop.xlane.xlu0 %401 }
  0xc2   : > { %1107 = vrsqrt.f32 %v444_v5  ;;  %v445_v12 = vmax.f32 %v402_v41, 1e-24 }
  0xc3   : > { %v406_v15 = vpop.xlane.xlu1 %405 }
  0xc4   : > { %1109 = vrsqrt.f32 %v445_v12  ;;  %v446_v18 = vmax.f32 %v406_v15, 1e-24 }
  0xc5   : > { %v1098_v40 = vpop.eup %1097  ;;  %v410_v20 = vpop.xlane.xlu0 %409 }
  0xc6   : > { %471 = vxpose.xlu1.b32.start [1/16] (narrow) %v1098_v40, 8  ;;  %1111 = vrsqrt.f32 %v446_v18  ;;  %v447_v24 = vmax.f32 %v410_v20, 1e-24 }
  0xc7   : > { %v414_v26 = vpop.xlane.xlu1 %413 }
  0xc8   : > { %1113 = vrsqrt.f32 %v447_v24  ;;  %v448_v29 = vmax.f32 %v414_v26, 1e-24 }
  0xc9   : > { %v1100_v53 = vpop.eup %1099  ;;  %v418_v32 = vpop.xlane.xlu0 %417 }
  0xca   : > { %472 = vxpose.xlu1.b32.cont [2/16] (narrow) %v1100_v53, 8  ;;  %v1102_v13 = vpop.eup %1101  ;;  %1115 = vrsqrt.f32 %v448_v29  ;;  %v449_v34 = vmax.f32 %v418_v32, 1e-24 }
  0xcb   : > { %v1104_v19 = vpop.eup %1103  ;;  %v422_v36 = vpop.xlane.xlu1 %421 }
  0xcc   : > { %1117 = vrsqrt.f32 %v449_v34  ;;  %v450_v43 = vmax.f32 %v422_v36, 1e-24 }
  0xcd   : > { %v1106_v25 = vpop.eup %1105  ;;  %v426_v45 = vpop.xlane.xlu0 %425 }
  0xce   : > { %473 = vxpose.xlu1.b32.cont [3/16] (narrow) %v1102_v13, 8  ;;  %1119 = vrsqrt.f32 %v450_v43  ;;  %v451_v46 = vmax.f32 %v426_v45, 1e-24 }
  0xcf   : > { %v1108_v30 = vpop.eup %1107  ;;  %v430_v33 = vpop.xlane.xlu1 %429 }
  0xd0   : > { %1121 = vrsqrt.f32 %v451_v46  ;;  %v452_v50 = vmax.f32 %v430_v33, 1e-24 }
  0xd1   : > { %v1110_v35 = vpop.eup %1109  ;;  %v434_v54 = vpop.xlane.xlu0 %433 }
  0xd2   : > { %474 = vxpose.xlu1.b32.cont [4/16] (narrow) %v1104_v19, 8  ;;  %1123 = vrsqrt.f32 %v452_v50  ;;  %v453_v56 = vmax.f32 %v434_v54, 1e-24 }
  0xd3   : > { %v1112_v44 = vpop.eup %1111  ;;  %v438_v14 = vpop.xlane.xlu1 %437 }
  0xd4   : > { %1125 = vrsqrt.f32 %v453_v56  ;;  %v454_v57 = vmax.f32 %v438_v14, 1e-24  ;;  %v709_v14 = vld [vmem:[#allocation4] sm:$0xff] }
  0xd5   : > { %v1114_v49 = vpop.eup %1113  ;;  %v334_v62 = vpop.xlane.xlu0 %333 }
  0xd6   : > { %475 = vxpose.xlu1.b32.cont [5/16] (narrow) %v1106_v25, 8  ;;  %1127 = vrsqrt.f32 %v454_v57  ;;  %v339_v63 = vmax.f32 %v334_v62, 1e-24  ;;  %v710_v62 = vld [vmem:[#allocation4 + $0x8] sm:$0xff] }
  0xd7   : > { %v1116_v52 = vpop.eup %1115  ;;  %v338_v3 = vpop.xlane.xlu1 %337 }
  0xd8   : > { %1129 = vrsqrt.f32 %v339_v63  ;;  %v340_v0 = vmax.f32 %v338_v3, 1e-24 }
  0xd9   : > { %v1118_v42 = vpop.eup %1117 }
  0xda   : > { %476 = vxpose.xlu1.b32.cont [6/16] (narrow) %v1108_v30, 8  ;;  %1131 = vrsqrt.f32 %v340_v0 }
  0xdb   : > { %v1120_v4 = vpop.eup %1119  ;;  %v1655_v47 = vpop.permute.xlu1 %649 }
  0xdc   : > { %vm652_vm9 = vcmp.eq.s32.totalorder %v1658_v22, %v1655_v47  ;;  %v728_v47 = vld [vmem:[#allocation2 + $0x8] sm:$0xff] }
  0xdd   : > { %v1122_v58 = vpop.eup %1121  ;;  %v647_v17 = vpop.permute.xlu0 %646 }
  0xde   : > { %477 = vxpose.xlu1.b32.cont [7/16] (narrow) %v1110_v35, 8  ;;  %vm651_vm8 = vcmp.eq.s32.totalorder %v1658_v22, %v647_v17 }
  0xdf   : > { %v1124_v59 = vpop.eup %1123 }
  0xe1   : > { %v1126_v2 = vpop.eup %1125 }
  0xe2   : > { %478 = vxpose.xlu1.b32.cont [8/16] (narrow) %v1112_v44, 8 }
  0xe3   : > { %v1128_v28 = vpop.eup %1127 }
  0xe5   : > { %v1130_v7 = vpop.eup %1129 }
  0xe6   : > { %479 = vxpose.xlu1.b32.cont [9/16] (narrow) %v1114_v49, 8 }
  0xe7   : > { %v1132_v31 = vpop.eup %1131 }
  0xea   : > { %480 = vxpose.xlu1.b32.cont [10/16] (narrow) %v1116_v52, 8 }
  0xee   : > { %481 = vxpose.xlu1.b32.cont [11/16] (narrow) %v1118_v42, 8 }
  0xf2   : > { %482 = vxpose.xlu1.b32.cont [12/16] (narrow) %v1120_v4, 8 }
  0xf6   : > { %483 = vxpose.xlu1.b32.cont [13/16] (narrow) %v1122_v58, 8 }
  0xfa   : > { %484 = vxpose.xlu1.b32.cont [14/16] (narrow) %v1124_v59, 8 }
  0xfe   : > { %485 = vxpose.xlu1.b32.cont [15/16] (narrow) %v1126_v2, 8 }
 0x102   : > { %486 = vxpose.xlu1.b32.end [16/16] (narrow) %v1128_v28, 8 }
 0x126   : > { %v628_v60 = vpop.f32.mrf.mxu1 }
 0x127   : > { %v623_v10 = vpop.f32.mrf.mxu0  ;;  %v633_v9 = vmul.f32 %v1132_v31, %v628_v60 }
 0x128   : > { %v630_v55 = vpop.f32.mrf.mxu1  ;;  %v632_v16 = vmul.f32 %v1130_v7, %v623_v10 }
 0x129   : > { %v625_v51 = vpop.f32.mrf.mxu0 }
 0x142   : > { %v487_v23 = vpop.trf.xlu1 }
 0x143   : > { %v637_v27 = vrot.slane %v487_v23, %v636_v11 }
 0x145   : > { %v638_v37 = vmul.f32 %v637_v27, %v632_v16  ;;  %v639_v38 = vmul.f32 %v637_v27, %v633_v9 }
 0x147   : > { %v653_v6 = vsel %vm651_vm8, %v638_v37, 0.0  ;;  %v654_v21 = vsel %vm652_vm9, %v639_v38, 0.0 }
 0x148   : > { %655 = vadd.xlane.f32.xlu0 %v653_v6 }
 0x14c   : > { %657 = vadd.xlane.f32.xlu0 %v654_v21 }
 0x1d1   : > { %v656_v40 = vpop.xlane.xlu0 %655 }
 0x1d2   : > { %v659_v5 = vmul.f32 %v656_v40, %v656_v40  ;;  %v972_v32 = vadd.f32 0.9800666, %v656_v40  ;;  %v681_v35 = vmul.f32 0.9800666, %v656_v40  ;;  %v974_v45 = vadd.f32 -0.039733864, %v656_v40 }
 0x1d4   : > { %v661_v41 = vsub.f32 1.0, %v659_v5  ;;  %vm689_vm13 = vcmp.gt.f32.partialorder %v972_v32, 0.0  ;;  %v737_v5 = vld [vmem:[#allocation3] sm:$0xff] }
 0x1d5   : > { %v658_v53 = vpop.xlane.xlu0 %657 }
 0x1d6   : > { %v663_v12 = vmax.f32 %v661_v41, 0.0  ;;  %v660_v13 = vmul.f32 %v658_v53, %v658_v53  ;;  %v973_v50 = vadd.f32 0.9800666, %v658_v53  ;;  %v682_v54 = vmul.f32 0.9800666, %v658_v53 }
 0x1d7   : > { %v975_v59 = vadd.f32 -0.039733864, %v658_v53 }
 0x1d8   : > { %v665_v15 = vmin.f32 %v663_v12, 1.0  ;;  %v662_v18 = vsub.f32 1.0, %v660_v13  ;;  %vm690_vm1 = vcmp.gt.f32.partialorder %v973_v50, 0.0 }
 0x1da   : > { %1133 = vrsqrt.f32 %v665_v15  ;;  %v664_v19 = vmax.f32 %v662_v18, 0.0  ;;  %vm669_vm10 = vcmp.eq.f32.partialorder %v665_v15, inf  ;;  %v672_v26 = vand.u32 2147483648, %v665_v15 }
 0x1db   : > { %vm671_vm11 = vcmp.eq.f32.partialorder %v665_v15, 0.0 }
 0x1dc   : > { %v666_v20 = vmin.f32 %v664_v19, 1.0 }
 0x1de   : > { %1135 = vrsqrt.f32 %v666_v20  ;;  %vm676_vm12 = vcmp.eq.f32.partialorder %v666_v20, inf  ;;  %v679_v46 = vand.u32 2147483648, %v666_v20  ;;  %vm678_vm14 = vcmp.eq.f32.partialorder %v666_v20, 0.0 }
 0x1e7   : > { %v1134_v24 = vpop.eup %1133 }
 0x1e8   : > { %v668_v25 = vmul.f32 %v1134_v24, %v665_v15 }
 0x1ea   : > { %v670_v29 = vsel %vm669_vm10, %v665_v15, %v668_v25  ;;  %v738_v15 = vld [vmem:[#allocation3 + $0x8] sm:$0xff] }
 0x1eb   : > { %v673_v30 = vsel %vm671_vm11, %v672_v26, %v670_v29  ;;  %v1136_v34 = vpop.eup %1135 }
 0x1ec   : > { %v683_v36 = vmul.f32 0.19866933, %v673_v30  ;;  %v675_v43 = vmul.f32 %v1136_v34, %v666_v20 }
 0x1ee   : > { %v685_v44 = vsub.f32 %v681_v35, %v683_v36  ;;  %v677_v49 = vsel %vm676_vm12, %v666_v20, %v675_v43 }
 0x1ef   : > { %v680_v33 = vsel %vm678_vm14, %v679_v46, %v677_v49 }
 0x1f0   : > { %v693_v52 = vsel %vm689_vm13, %v685_v44, %v974_v45  ;;  %v684_v56 = vmul.f32 0.19866933, %v680_v33 }
 0x1f1   : > { %v695_v42 = vsel %vm651_vm8, %v693_v52, %v638_v37  ;;  %v711_v57 = vmul.f32 30.0, %v693_v52 }
 0x1f2   : > { %v697_v4 = vmul.f32 30.0, %v695_v42  ;;  %v686_v58 = vsub.f32 %v682_v54, %v684_v56 }
 0x1f3   : > { %v713_v2 = vsel %vm1613_vm7, %v711_v57, 0.0 }
 0x1f4   : > { %v715_v28 = vadd.f32 %v713_v2, %v709_v14  ;;  %v721_v60 = vsel %vm720_vm15, %v697_v4, -1e+30  ;;  %699 = vst [vmem:[%s1371_s14] sm:$0xff] %v697_v4  ;;  %v694_v10 = vsel %vm690_vm1, %v686_v58, %v975_v59 }
 0x1f5   : > { %723 = vmax.xlane.f32.xlu0 %v721_v60  ;;  %v696_v55 = vsel %vm652_vm9, %v694_v10, %v639_v38  ;;  %v712_v51 = vmul.f32 30.0, %v694_v10 }
 0x1f6   : > { %718 = vst.msk [vmem:[#allocation4] sm:$0xff] %vm717_vm0, %v715_v28  ;;  %v698_v8 = vmul.f32 30.0, %v696_v55 }
 0x1f7   : > { %v714_v63 = vsel %vm1558_vm4, %v712_v51, 0.0 }
 0x1f8   : > { %v716_v3 = vadd.f32 %v714_v63, %v710_v62  ;;  %v722_v0 = vsel %vm720_vm15, %v698_v8, -1e+30  ;;  %700 = vst [vmem:[%s1371_s14 + $0x8] sm:$0xff] %v698_v8 }
 0x1f9   : > { %725 = vmax.xlane.f32.xlu0 %v722_v0 }
 0x1fa   : > { %719 = vst.msk [vmem:[#allocation4 + $0x8] sm:$0xff] %vm717_vm0, %v716_v3 }
 0x27e   : > { %v724_v48 = vpop.xlane.xlu0 %723 }
 0x27f   : > { %v729_v7 = vmax.f32 %v727_v1, %v724_v48 }
 0x281   : > { %v731_v61 = vsub.f32 %v727_v1, %v729_v7  ;;  %765 = vst.msk [vmem:[#allocation2] sm:$0xff] %vm717_vm0, %v729_v7  ;;  %743 = vperm.xlu0 %1095, %v729_v7  }
 0x282   : > { %v726_v11 = vpop.xlane.xlu0 %725 }
 0x283   : > { %v730_v16 = vmax.f32 %v728_v47, %v726_v11  ;;  %v733_v38 = vmul.f32 1.442695, %v731_v61 }
 0x285   : > { %v732_v39 = vsub.f32 %v728_v47, %v730_v16  ;;  %766 = vst.msk [vmem:[#allocation2 + $0x8] sm:$0xff] %vm717_vm0, %v730_v16  ;;  %748 = vperm.xlu0 %1095, %v730_v16  }
 0x287   : > { %v735_v21 = vmul.f32 1.442695, %v732_v39 }
 0x2fc   : > { %v744_v17 = vpop.permute.xlu0 %743 }
 0x2fd   : > { %v751_v22 = vsub.f32 %v721_v60, %v744_v17 }
 0x2ff   : > { %v753_v23 = vmul.f32 1.442695, %v751_v22 }
 0x300   : > { %v749_v27 = vpop.permute.xlu0 %748 }
 0x301   : > { %1137 = vpow2.f32 %v753_v23  ;;  %v752_v31 = vsub.f32 %v722_v0, %v749_v27 }
 0x303   : > { %v755_v9 = vmul.f32 1.442695, %v752_v31 }
 0x305   : > { %1139 = vpow2.f32 %v755_v9 }
 0x306   : > { %1141 = vpow2.f32 %v733_v38 }
 0x307   : > { %1143 = vpow2.f32 %v735_v21 }
 0x30e   : > { %v1138_v37 = vpop.eup %1137 }
 0x30f   : > { %757 = vadd.xlane.f32.xlu0 %v1138_v37 }
 0x312   : > { %v1140_v6 = vpop.eup %1139 }
 0x313   : > { %759 = vadd.xlane.f32.xlu1 %v1140_v6  ;;  %v1142_v40 = vpop.eup %1141 }
 0x314   : > { %v739_v41 = vmul.f32 %v1142_v40, %v737_v5  ;;  %v1144_v12 = vpop.eup %1143 }
 0x315   : > { %v740_v18 = vmul.f32 %v1144_v12, %v738_v15 }
 0x398   : > { %v758_v53 = vpop.xlane.xlu0 %757 }
 0x399   : > { %v761_v13 = vadd.f32 %v758_v53, %v739_v41 }
 0x39b   : > { %763 = vst.msk [vmem:[#allocation3] sm:$0xff] %vm717_vm0, %v761_v13  ;;  %770 = sbr.rel (%p976_p1) target bundleno = 956 (0x3bc), region = 40 }
 0x39c   : > { %v760_v19 = vpop.xlane.xlu1 %759 }
 0x39d   : > { %v762_v20 = vadd.f32 %v760_v19, %v740_v18 }
 0x39f   : > { %764 = vst.msk [vmem:[#allocation3 + $0x8] sm:$0xff] %vm717_vm0, %v762_v20 }
 0x3a0   : > { %v771_v29 = vld [vmem:[#allocation2] sm:$0xff]  ;;  %v772_v34 = vld [vmem:[#allocation2 + $0x8] sm:$0xff] }
 0x3a1   : > { %v781_v35 = vld [vmem:[#allocation4] sm:$0xff]  ;;  %v782_v44 = vld [vmem:[#allocation4 + $0x8] sm:$0xff] }
 0x3a2   : > { %v773_v24 = vld [vmem:[#allocation3] sm:$0xff] }
 0x3a3   : > { %1145 = vlog2.f32 %v773_v24 }
 0x3a6   : > { %v774_v25 = vld [vmem:[#allocation3 + $0x8] sm:$0xff] }
 0x3a7   : > { %1147 = vlog2.f32 %v774_v25 }
 0x3b0   : > { %v1146_v26 = vpop.eup %1145 }
 0x3b1   : > { %v776_v32 = vmul.f32 0.6931472, %v1146_v26 }
 0x3b3   : > { %v779_v43 = vadd.f32 %v776_v32, %v771_v29 }
 0x3b4   : > { %v1148_v30 = vpop.eup %1147 }
 0x3b5   : > { %v778_v36 = vmul.f32 0.6931472, %v1148_v30  ;;  %v783_v46 = vsub.f32 %v779_v43, %v781_v35 }
 0x3b7   : > { %v780_v45 = vadd.f32 %v778_v36, %v772_v34  ;;  %785 = vst.msk [vmem:[%s1364_s8] sm:$0xff] %vm717_vm0, %v783_v46 }
 0x3b9   : > { %v784_v49 = vsub.f32 %v780_v45, %v782_v44 }
 0x3bb   : > { %786 = vst.msk [vmem:[%s1364_s8 + $0x8] sm:$0xff] %vm717_vm0, %v784_v49 }
 0x3bc PF: > { %s985_s25 = sshll.u32 %s1229_s19, 2  ;;  %s808_s10 = sshll.u32 %s1371_s14, 4  ;;  %s1698_s10 = int_to_ptr.vmem [resolvable:$true] %s808_s10 }
 0x3bd   : > { %s805_s26 = sadd.s32 %s1225_s18, %s985_s25  ;;  %s1778_s8 = sand.u32 1, %s1217_s16  }
 0x3be   : > { %s980_s11 = sshll.u32 %s805_s26, 7  ;;  %s1707_s24 = scalar_lea.sflag [#allocation6], %s1778_s8 }
 0x3bf   : > { %s1703_s23 = scalar_lea.hbm %s1761_s3, %s980_s11  ;;  %s1149_s27 = scalar_lea.vmem %s1698_s10, 256 }
 0x3c0   : > { %p1150_p2 = scmp.ne.s32.totalorder %s1698_s10, %s1149_s27  ;;  %s1246_s18 = smov [#allocation5]  }
 0x3c1   : > { %s1153_s19 = sshll.u32 %s1246_s18, 4  ;;  %s1154_s19 = int_to_ptr.vmem [resolvable:$false] %s1153_s19 }
 0x3c2   : > { %p1151_p4 = pnand %p1150_p2, %p1326_p3  ;;  %s1155_s30 = scalar_lea.vmem %s1154_s19, 512 }
 0x3c3   : > { %p1156_p6 = scmp.lt.s32.totalorder %s1698_s10, %s1154_s19  ;;  %p1157_p7 = scmp.lt.s32.totalorder %s1155_s30, %s1149_s27 }
 0x3c4   : > { %p1152_p5 = pneg %p1151_p4 }
 0x3c5   : > { %p1158_p9 = por %p1157_p7, %p1156_p6 }
 0x3c7   : > { %p1159_p10 = pnand %p1158_p9, %p1152_p5 }
 0x3c9   : > { %1162 = shalt.err (!%p1159_p10)
}
 0x3ca   : > { %s1163_s5 = scalar_lea.hbm %s1703_s23, 256  ;;  %s1167_s14 = scalar_lea.hbm %s1761_s3, 1024 }
 0x3cb   : > { %p1164_p11 = scmp.ne.s32.totalorder %s1703_s23, %s1163_s5  ;;  %p1168_p0 = scmp.lt.s32.totalorder %s1703_s23, %s1761_s3 }
 0x3cc   : > { %p1169_p1 = scmp.lt.s32.totalorder %s1167_s14, %s1163_s5 }
 0x3cd   : > { %p1165_p12 = pnand %p1164_p11, %p1326_p3 }
 0x3ce   : > { %p1170_p2 = por %p1169_p1, %p1168_p0 }
 0x3cf   : > { %p1166_p13 = pneg %p1165_p12 }
 0x3d1   : > { %p1171_p4 = pnand %p1170_p2, %p1166_p13 }
 0x3d3   : > { %1174 = shalt.err (!%p1171_p4)
}
 0x3d4   : > { %s1247_s25 = smov 128   ;;  %s1248_s26 = smov 256  }
 0x3d5   : > { %s1249_s11 = smov 8  }
 0x3d6   : > { %1018 = dma.vmem_to_hbm [thread:$0]  (%p1326_p3), %s1698_s10, 256, %s1703_s23, %s1707_s24, %s1247_s25, %s1248_s26, %s1249_s11  }
 0x3d7 PF: > { %p1024_p5 = scmp.ge.s32.totalorder %s1241_s22, 2  ;;  %s827_s12 = sand.u32 1, %s1213_s15  }
 0x3d8   : > { %s828_s13 = scalar_lea.sflag [#allocation6], %s827_s12 }
 0x3d9   : > { %p1021_p6 = pnand %p1024_p5, %p1335_p8 }
 0x3db   : > { %p1022_p7 = pneg %p1021_p6 }
 0x3dd   : > { %1208 = dma.done.wait (%p1022_p7), %s828_s13, 256  }
 0x3de   : > { %1210 = vsyncadd (%p1022_p7), %s828_s13, 4294967040  ;;  %s18_s22 = sadd.s32 1, %s1241_s22   ;;  %s1779_s18 = sld [smem:[#allocation8_spill]] }
 0x3df   : > { %p15_p9 = scmp.ge.s32.totalorder %s18_s22, 6   ;;  %s1780_s19 = sld [smem:[#allocation9_spill]] }
 0x3e0   : > { %s1781_s20 = sld [smem:[#allocation10_spill]]  ;;  %s1783_s15 = smov %s1217_s16 }
 0x3e1   : > { %s1782_s21 = sld [smem:[#allocation11_spill]]  ;;  %s1784_s16 = smov %s1221_s17 }
 0x3e2   : > { %s1785_s17 = smov %s1344_s7  ;;  %17 = sbr.rel (!%p15_p9) target bundleno = 5 (0x5), region = 93 }
 0x3e7   :  { %841 = vsyncpa [#allocation6], 1 }
 0x3e8   :  { %843 = vsyncpa [#allocation6 + $0x1], 1 }

</bundles_post_ra>
